<compile_context>
chip_gen: v5e
topology: v5e:2x2
jax: 0.10.0
libtpu: 0.0.40
codegen_flags: <defaults>
</compile_context>

<pallas_src>
from math import sqrt

import jax
import jax.numpy as jnp
from jax import lax
from jax.experimental import pallas as pl
from jax.experimental.pallas import tpu as pltpu

_GAIN = sqrt(2.0)          # StyleBlock.act_gain
_LRELU_SLOPE = 0.2


# ---------------------------------------------------------------------------
# Fused kernel: grid=(B,), one sample per step, both ModConv layers + act + norm.
# ---------------------------------------------------------------------------
def _style_block_kernel(x_ref, s0_ref, d0_ref, s1_ref, d1_ref,
                        m0_ref, m1_ref, b0_ref, b1_ref, a_ref, o_ref):
    H, WCo = o_ref.shape[1], o_ref.shape[2]

    # Row-shift matrices for the ky=0 / ky=2 taps (x-direction taps and the zero
    # x-padding are already folded into the banded weight).
    r = lax.broadcasted_iota(jnp.int32, (H, H), 0)
    c = lax.broadcasted_iota(jnp.int32, (H, H), 1)
    shift_dn = (c == r - 1).astype(jnp.float32)   # (shift_dn @ p)[y] = p[y-1], zero at y=0
    shift_up = (c == r + 1).astype(jnp.float32)   # (shift_up @ p)[y] = p[y+1], zero at y=H-1

    a_mat = a_ref[...]                            # (WCo, WCo) per-pixel channel-mean matrix

    def conv_act_norm(xm, m_ref, d_t, b_t):
        # xm: (H, W*Cin) modulated activations; m_ref: (W*Cin, 3*W*Cout) banded weight.
        p = jnp.dot(xm, m_ref[...], preferred_element_type=jnp.float32)        # (H, 3*WCo)
        p0 = p[:, 0 * WCo:1 * WCo]                # ky=0 tap:  out[y] += p0[y-1]
        p1 = p[:, 1 * WCo:2 * WCo]                # ky=1 tap:  out[y] += p1[y]
        p2 = p[:, 2 * WCo:3 * WCo]                # ky=2 tap:  out[y] += p2[y+1]
        acc = (p1
               + jnp.dot(shift_dn, p0, preferred_element_type=jnp.float32)
               + jnp.dot(shift_up, p2, preferred_element_type=jnp.float32))
        z = acc * d_t + b_t                                                    # demodulate + bias
        z = jnp.where(z >= 0.0, _GAIN * z, (_GAIN * _LRELU_SLOPE) * z)         # lrelu*sqrt(2), gain folded
        ms = jnp.dot(z * z, a_mat, preferred_element_type=jnp.float32)         # mean_c(z^2) per pixel
        return z * lax.rsqrt(ms + 1e-8)                                        # PixelNorm over channels

    x = x_ref[0]                                                               # (H, W*Cin1)
    h = conv_act_norm(x * s0_ref[0], m0_ref, d0_ref[0], b0_ref[...])           # ModConv0 block
    h = conv_act_norm(h * s1_ref[0], m1_ref, d1_ref[0], b1_ref[...])           # ModConv1 block
    o_ref[...] = h[None].astype(o_ref.dtype)


# ---------------------------------------------------------------------------
# Wrapper-side (plain XLA) precompute: style scales, demod tables, banded weights.
# ---------------------------------------------------------------------------
def _style_scale(latent, lin_w, lin_b):
    """s = 1 + PixelNorm(EqualLinear(latent)).  Tiny matmul -> plain XLA, no launch."""
    scale = sqrt(2.0 / lin_w.shape[0])                      # equal-lr scale
    y = latent @ (lin_w * scale) + lin_b
    y = y * lax.rsqrt(jnp.mean(y * y, axis=1, keepdims=True) + 1e-8)
    return 1.0 + y                                          # (B, C)


def _banded_weight(w_oihw, W):
    """Fold the 3 kx taps + zero x-padding of the 3x3 conv into a block-banded
    (W*Cin, 3*W*Cout) matrix (batch independent), plus sum_k w^2 for demodulation."""
    Cout, Cin = w_oihw.shape[0], w_oihw.shape[1]
    w_scale = sqrt(2.0 / (Cin * 9))                         # sqrt(2 / fan_in)
    w = jnp.transpose(w_oihw, (2, 3, 1, 0)) * w_scale       # (ky, kx, Cin, Cout)
    xo = jnp.arange(W)
    # T[kx, xi, xo] = 1 iff xi == xo + kx - 1  (out-of-range == zero padding)
    T = (xo[None, :, None] == xo[None, None, :] + jnp.arange(3)[:, None, None] - 1)
    # M[ky, xi, ci, xo, co] = sum_kx w[ky, kx, ci, co] * T[kx, xi, xo]
    M = jnp.einsum('abcd,bef->aecfd', w, T.astype(w.dtype))
    Mcat = jnp.transpose(M, (1, 2, 0, 3, 4)).reshape(W * Cin, 3 * W * Cout)
    w2 = jnp.sum(w * w, axis=(0, 1))                        # (Cin, Cout)
    return Mcat, w2


def style_block_forward(x_nchw, latent, params):
    B, Cin, H, W = x_nchw.shape
    Cout = params["w0"].shape[0]
    WC1, WCo = W * Cin, W * Cout

    # Batch-independent weight prep + per-sample style/demod factors (all tiny, XLA).
    m0, w2_0 = _banded_weight(params["w0"], W)                       # (WC1, 3*WCo), (Cin, Cout)
    m1, w2_1 = _banded_weight(params["w1"], W)                       # (WCo, 3*WCo), (Cout, Cout)
    s0 = _style_scale(latent, params["lin0_w"], params["lin0_b"])    # (B, Cin)
    s1 = _style_scale(latent, params["lin1_w"], params["lin1_b"])    # (B, Cout)
    d0 = lax.rsqrt((s0 * s0) @ w2_0 + 1e-5)                          # (B, Cout)
    d1 = lax.rsqrt((s1 * s1) @ w2_1 + 1e-5)                          # (B, Cout)

    # Lane-dense layouts: activations as (H, W*C); per-channel vectors tiled W times.
    x2d = jnp.transpose(x_nchw, (0, 2, 3, 1)).reshape(B, H, WC1)
    s0t = jnp.tile(s0, (1, W)).reshape(B, 1, WC1)
    s1t = jnp.tile(s1, (1, W)).reshape(B, 1, WCo)
    d0t = jnp.tile(d0, (1, W)).reshape(B, 1, WCo)
    d1t = jnp.tile(d1, (1, W)).reshape(B, 1, WCo)
    b0t = jnp.tile(params["b0"].reshape(1, Cout), (1, W))            # (1, WCo)
    b1t = jnp.tile(params["b1"].reshape(1, Cout), (1, W))
    lane = jnp.arange(WCo)
    a_mat = ((lane[:, None] // Cout) == (lane[None, :] // Cout)).astype(jnp.float32) / Cout

    out2d = pl.pallas_call(
        _style_block_kernel,
        out_shape=jax.ShapeDtypeStruct((B, H, WCo), jnp.float32),
        grid_spec=pltpu.PrefetchScalarGridSpec(
            num_scalar_prefetch=0,
            grid=(B,),
            in_specs=[
                pl.BlockSpec((1, H, WC1), lambda b: (b, 0, 0)),      # x (lane-dense)
                pl.BlockSpec((1, 1, WC1), lambda b: (b, 0, 0)),      # s0 tiled over lanes
                pl.BlockSpec((1, 1, WCo), lambda b: (b, 0, 0)),      # d0 tiled
                pl.BlockSpec((1, 1, WCo), lambda b: (b, 0, 0)),      # s1 tiled
                pl.BlockSpec((1, 1, WCo), lambda b: (b, 0, 0)),      # d1 tiled
                pl.BlockSpec((WC1, 3 * WCo), lambda b: (0, 0)),      # banded weight, layer 0 (shared)
                pl.BlockSpec((WCo, 3 * WCo), lambda b: (0, 0)),      # banded weight, layer 1 (shared)
                pl.BlockSpec((1, WCo), lambda b: (0, 0)),            # bias 0 (tiled)
                pl.BlockSpec((1, WCo), lambda b: (0, 0)),            # bias 1 (tiled)
                pl.BlockSpec((WCo, WCo), lambda b: (0, 0)),          # PixelNorm channel-mean matrix
            ],
            out_specs=pl.BlockSpec((1, H, WCo), lambda b: (b, 0, 0)),
        ),
        compiler_params=pltpu.CompilerParams(
            dimension_semantics=("parallel",),            # batch axis -> both TCs on v7x
            vmem_limit_bytes=32 * 1024 * 1024,            # working set < 1 MiB; explicit headroom
        ),
    )(x2d, s0t, d0t, s1t, d1t, m0, m1, b0t, b1t, a_mat)

    return jnp.transpose(out2d.reshape(B, H, W, Cout), (0, 3, 1, 2))  # back to NCHW


# ---------------------------------------------------------------------------
# Pure-JAX reference (mirrors the PyTorch module) for a correctness check
# ---------------------------------------------------------------------------
def _ref_modconv(x_nchw, latent, w_oihw, bias, lin_w, lin_b):
    B, Cin, H, W = x_nchw.shape
    y = latent @ (lin_w * sqrt(2.0 / lin_w.shape[0])) + lin_b         # EqualLinear
    y = y * lax.rsqrt(jnp.mean(y * y, axis=1, keepdims=True) + 1e-8)  # PixelNorm
    s = 1.0 + y                                                       # (B, Cin)
    w = w_oihw * sqrt(2.0 / (Cin * 9))
    w = s[:, None, :, None, None] * w[None]                           # (B, Cout, Cin, 3, 3)
    d = lax.rsqrt(jnp.sum(w * w, axis=(2, 3, 4), keepdims=True) + 1e-5)
    w = d * w
    outs = []
    for b in range(B):
        o = lax.conv_general_dilated(
            x_nchw[b:b + 1], w[b], window_strides=(1, 1), padding=((1, 1), (1, 1)),
            dimension_numbers=("NCHW", "OIHW", "NCHW"))
        outs.append(o)
    return jnp.concatenate(outs, axis=0) + bias


def _ref_style_block(x, latent, p):
    o = _ref_modconv(x, latent, p["w0"], p["b0"], p["lin0_w"], p["lin0_b"])
    o = jnp.where(o >= 0, o, 0.2 * o) * _GAIN
    o = o * lax.rsqrt(jnp.mean(o * o, axis=1, keepdims=True) + 1e-8)
    o = _ref_modconv(o, latent, p["w1"], p["b1"], p["lin1_w"], p["lin1_b"])
    o = jnp.where(o >= 0, o, 0.2 * o) * _GAIN
    o = o * lax.rsqrt(jnp.mean(o * o, axis=1, keepdims=True) + 1e-8)
    return o


# ---------------------------------------------------------------------------
if __name__ == "__main__":
    B, nc1, nc2, style_dim, H, W = 2, 4, 8, 32, 16, 16

    key = jax.random.PRNGKey(0)
    ks = jax.random.split(key, 10)
    x = jax.random.normal(ks[0], (B, nc1, H, W), jnp.float32)
    latent = jax.random.normal(ks[1], (B, style_dim), jnp.float32)

    params = {
        # ModConv0: nc1 -> nc2
        "w0": jax.random.normal(ks[2], (nc2, nc1, 3, 3), jnp.float32),
        "b0": 0.1 * jax.random.normal(ks[3], (1, nc2, 1, 1), jnp.float32),
        "lin0_w": jax.random.normal(ks[4], (style_dim, nc1), jnp.float32),
        "lin0_b": 0.1 * jax.random.normal(ks[5], (1, nc1), jnp.float32),
        # ModConv1: nc2 -> nc2
        "w1": jax.random.normal(ks[6], (nc2, nc2, 3, 3), jnp.float32),
        "b1": 0.1 * jax.random.normal(ks[7], (1, nc2, 1, 1), jnp.float32),
        "lin1_w": jax.random.normal(ks[8], (style_dim, nc2), jnp.float32),
        "lin1_b": 0.1 * jax.random.normal(ks[9], (1, nc2, 1, 1), jnp.float32).reshape(1, nc2),
    }

    fwd = jax.jit(style_block_forward)
    out = jax.block_until_ready(fwd(x, latent, params))
    assert out.shape == (B, nc2, H, W), out.shape

    ref = jax.block_until_ready(_ref_style_block(x, latent, params))
    max_err = float(jnp.max(jnp.abs(out - ref)))
    # Everything here is f32; the tolerance covers TPU default-precision matmul/conv
    # passes in the XLA reference path.  TODO(synk): tighten together with
    # precision='highest' references if bf16 conv operands are introduced.
    assert jnp.allclose(out, ref, atol=1e-2, rtol=1e-2), max_err

    print("KERNEL_OK")
</pallas_src>

<mosaic_0001>
module attributes {stable_mosaic.version = 11 : i64} {
  func.func @_style_block_kernel(%arg0: i32, %arg1: memref<1x16x64xf32, #tpu.memory_space<vmem>>, %arg2: memref<1x1x64xf32, #tpu.memory_space<vmem>>, %arg3: memref<1x1x128xf32, #tpu.memory_space<vmem>>, %arg4: memref<1x1x128xf32, #tpu.memory_space<vmem>>, %arg5: memref<1x1x128xf32, #tpu.memory_space<vmem>>, %arg6: memref<64x384xf32, #tpu.memory_space<vmem>>, %arg7: memref<128x384xf32, #tpu.memory_space<vmem>>, %arg8: memref<1x128xf32, #tpu.memory_space<vmem>>, %arg9: memref<1x128xf32, #tpu.memory_space<vmem>>, %arg10: memref<128x128xf32, #tpu.memory_space<vmem>>, %arg11: memref<1x16x128xf32, #tpu.memory_space<vmem>>) attributes {dimension_semantics = [#tpu.dimension_semantics<parallel>], iteration_bounds = array<i64: 2>, scalar_prefetch = 0 : i64, scratch_operands = 0 : i64, tpu.core_type = #tpu.core_type<tc>, window_params = [{transform_indices = @transform_0, window_bounds = array<i64: 1, 16, 64>}, {transform_indices = @transform_1, window_bounds = array<i64: 1, 1, 64>}, {transform_indices = @transform_2, window_bounds = array<i64: 1, 1, 128>}, {transform_indices = @transform_3, window_bounds = array<i64: 1, 1, 128>}, {transform_indices = @transform_4, window_bounds = array<i64: 1, 1, 128>}, {pipeline_mode = #tpu.pipeline_mode<synchronous>, transform_indices = @transform_5, window_bounds = array<i64: 64, 384>}, {pipeline_mode = #tpu.pipeline_mode<synchronous>, transform_indices = @transform_6, window_bounds = array<i64: 128, 384>}, {pipeline_mode = #tpu.pipeline_mode<synchronous>, transform_indices = @transform_7, window_bounds = array<i64: 1, 128>}, {pipeline_mode = #tpu.pipeline_mode<synchronous>, transform_indices = @transform_8, window_bounds = array<i64: 1, 128>}, {pipeline_mode = #tpu.pipeline_mode<synchronous>, transform_indices = @transform_9, window_bounds = array<i64: 128, 128>}, {transform_indices = @transform_10, window_bounds = array<i64: 1, 16, 128>}]} {
    %0 = tpu.iota {dimensions = array<i32: 0>} : vector<16x16xi32>
    %1 = tpu.iota {dimensions = array<i32: 1>} : vector<16x16xi32>
    %c1_i32 = arith.constant 1 : i32
    %2 = vector.broadcast %c1_i32 : i32 to vector<16x16xi32>
    %3 = arith.subi %0, %2 : vector<16x16xi32>
    %4 = arith.cmpi eq, %1, %3 : vector<16x16xi32>
    %5 = arith.extui %4 : vector<16x16xi1> to vector<16x16xi32>
    %6 = arith.sitofp %5 : vector<16x16xi32> to vector<16x16xf32>
    %c1_i32_0 = arith.constant 1 : i32
    %7 = vector.broadcast %c1_i32_0 : i32 to vector<16x16xi32>
    %8 = arith.addi %0, %7 : vector<16x16xi32>
    %9 = arith.cmpi eq, %1, %8 : vector<16x16xi32>
    %10 = arith.extui %9 : vector<16x16xi1> to vector<16x16xi32>
    %11 = arith.sitofp %10 : vector<16x16xi32> to vector<16x16xf32>
    %c0 = arith.constant 0 : index
    %c0_1 = arith.constant 0 : index
    %12 = vector.load %arg10[%c0, %c0_1] : memref<128x128xf32, #tpu.memory_space<vmem>>, vector<128x128xf32>
    %c0_2 = arith.constant 0 : index
    %c0_3 = arith.constant 0 : index
    %c0_4 = arith.constant 0 : index
    %13 = vector.load %arg1[%c0_2, %c0_3, %c0_4] : memref<1x16x64xf32, #tpu.memory_space<vmem>>, vector<1x16x64xf32>
    %14 = vector.shape_cast %13 : vector<1x16x64xf32> to vector<16x64xf32>
    %c0_5 = arith.constant 0 : index
    %c0_6 = arith.constant 0 : index
    %c0_7 = arith.constant 0 : index
    %15 = vector.load %arg2[%c0_5, %c0_6, %c0_7] : memref<1x1x64xf32, #tpu.memory_space<vmem>>, vector<1x1x64xf32>
    %16 = vector.shape_cast %15 : vector<1x1x64xf32> to vector<1x64xf32>
    %17 = vector.broadcast %16 : vector<1x64xf32> to vector<16x64xf32>
    %18 = arith.mulf %14, %17 : vector<16x64xf32>
    %c0_8 = arith.constant 0 : index
    %c0_9 = arith.constant 0 : index
    %c0_10 = arith.constant 0 : index
    %19 = vector.load %arg3[%c0_8, %c0_9, %c0_10] : memref<1x1x128xf32, #tpu.memory_space<vmem>>, vector<1x1x128xf32>
    %20 = vector.shape_cast %19 : vector<1x1x128xf32> to vector<1x128xf32>
    %c0_11 = arith.constant 0 : index
    %c0_12 = arith.constant 0 : index
    %21 = vector.load %arg8[%c0_11, %c0_12] : memref<1x128xf32, #tpu.memory_space<vmem>>, vector<1x128xf32>
    %c0_13 = arith.constant 0 : index
    %c0_14 = arith.constant 0 : index
    %22 = vector.load %arg6[%c0_13, %c0_14] : memref<64x384xf32, #tpu.memory_space<vmem>>, vector<64x384xf32>
    %cst = arith.constant dense<0.000000e+00> : vector<16x384xf32>
    %23 = tpu.matmul %18, %22, %cst {dimension_numbers = #tpu.dot_dimension_numbers<[1], [0], [0], [1], [0, 0, 1, 1], [], []>} : vector<16x64xf32>, vector<64x384xf32>, vector<16x384xf32> -> vector<16x384xf32>
    %24 = vector.extract_strided_slice %23 {offsets = [0, 0], sizes = [16, 128], strides = [1, 1]} : vector<16x384xf32> to vector<16x128xf32>
    %25 = vector.extract_strided_slice %23 {offsets = [0, 128], sizes = [16, 128], strides = [1, 1]} : vector<16x384xf32> to vector<16x128xf32>
    %26 = vector.extract_strided_slice %23 {offsets = [0, 256], sizes = [16, 128], strides = [1, 1]} : vector<16x384xf32> to vector<16x128xf32>
    %cst_15 = arith.constant dense<0.000000e+00> : vector<16x128xf32>
    %27 = tpu.matmul %6, %24, %cst_15 {dimension_numbers = #tpu.dot_dimension_numbers<[1], [0], [0], [1], [0, 0, 1, 1], [], []>} : vector<16x16xf32>, vector<16x128xf32>, vector<16x128xf32> -> vector<16x128xf32>
    %28 = arith.addf %25, %27 : vector<16x128xf32>
    %cst_16 = arith.constant dense<0.000000e+00> : vector<16x128xf32>
    %29 = tpu.matmul %11, %26, %cst_16 {dimension_numbers = #tpu.dot_dimension_numbers<[1], [0], [0], [1], [0, 0, 1, 1], [], []>} : vector<16x16xf32>, vector<16x128xf32>, vector<16x128xf32> -> vector<16x128xf32>
    %30 = arith.addf %28, %29 : vector<16x128xf32>
    %31 = vector.broadcast %20 : vector<1x128xf32> to vector<16x128xf32>
    %32 = arith.mulf %30, %31 : vector<16x128xf32>
    %33 = vector.broadcast %21 : vector<1x128xf32> to vector<16x128xf32>
    %34 = arith.addf %32, %33 : vector<16x128xf32>
    %cst_17 = arith.constant 0.000000e+00 : f32
    %35 = vector.broadcast %cst_17 : f32 to vector<16x128xf32>
    %36 = arith.cmpf oge, %34, %35 : vector<16x128xf32>
    %cst_18 = arith.constant 1.41421354 : f32
    %37 = vector.broadcast %cst_18 : f32 to vector<16x128xf32>
    %38 = arith.mulf %37, %34 : vector<16x128xf32>
    %cst_19 = arith.constant 0.282842726 : f32
    %39 = vector.broadcast %cst_19 : f32 to vector<16x128xf32>
    %40 = arith.mulf %39, %34 : vector<16x128xf32>
    %41 = arith.select %36, %38, %40 : vector<16x128xi1>, vector<16x128xf32>
    %42 = arith.mulf %41, %41 : vector<16x128xf32>
    %cst_20 = arith.constant dense<0.000000e+00> : vector<16x128xf32>
    %43 = tpu.matmul %42, %12, %cst_20 {dimension_numbers = #tpu.dot_dimension_numbers<[1], [0], [0], [1], [0, 0, 1, 1], [], []>} : vector<16x128xf32>, vector<128x128xf32>, vector<16x128xf32> -> vector<16x128xf32>
    %cst_21 = arith.constant 9.99999993E-9 : f32
    %44 = vector.broadcast %cst_21 : f32 to vector<16x128xf32>
    %45 = arith.addf %43, %44 : vector<16x128xf32>
    %46 = math.rsqrt %45 : vector<16x128xf32>
    %47 = arith.mulf %41, %46 : vector<16x128xf32>
    %c0_22 = arith.constant 0 : index
    %c0_23 = arith.constant 0 : index
    %c0_24 = arith.constant 0 : index
    %48 = vector.load %arg4[%c0_22, %c0_23, %c0_24] : memref<1x1x128xf32, #tpu.memory_space<vmem>>, vector<1x1x128xf32>
    %49 = vector.shape_cast %48 : vector<1x1x128xf32> to vector<1x128xf32>
    %50 = vector.broadcast %49 : vector<1x128xf32> to vector<16x128xf32>
    %51 = arith.mulf %47, %50 : vector<16x128xf32>
    %c0_25 = arith.constant 0 : index
    %c0_26 = arith.constant 0 : index
    %c0_27 = arith.constant 0 : index
    %52 = vector.load %arg5[%c0_25, %c0_26, %c0_27] : memref<1x1x128xf32, #tpu.memory_space<vmem>>, vector<1x1x128xf32>
    %53 = vector.shape_cast %52 : vector<1x1x128xf32> to vector<1x128xf32>
    %c0_28 = arith.constant 0 : index
    %c0_29 = arith.constant 0 : index
    %54 = vector.load %arg9[%c0_28, %c0_29] : memref<1x128xf32, #tpu.memory_space<vmem>>, vector<1x128xf32>
    %c0_30 = arith.constant 0 : index
    %c0_31 = arith.constant 0 : index
    %55 = vector.load %arg7[%c0_30, %c0_31] : memref<128x384xf32, #tpu.memory_space<vmem>>, vector<128x384xf32>
    %cst_32 = arith.constant dense<0.000000e+00> : vector<16x384xf32>
    %56 = tpu.matmul %51, %55, %cst_32 {dimension_numbers = #tpu.dot_dimension_numbers<[1], [0], [0], [1], [0, 0, 1, 1], [], []>} : vector<16x128xf32>, vector<128x384xf32>, vector<16x384xf32> -> vector<16x384xf32>
    %57 = vector.extract_strided_slice %56 {offsets = [0, 0], sizes = [16, 128], strides = [1, 1]} : vector<16x384xf32> to vector<16x128xf32>
    %58 = vector.extract_strided_slice %56 {offsets = [0, 128], sizes = [16, 128], strides = [1, 1]} : vector<16x384xf32> to vector<16x128xf32>
    %59 = vector.extract_strided_slice %56 {offsets = [0, 256], sizes = [16, 128], strides = [1, 1]} : vector<16x384xf32> to vector<16x128xf32>
    %cst_33 = arith.constant dense<0.000000e+00> : vector<16x128xf32>
    %60 = tpu.matmul %6, %57, %cst_33 {dimension_numbers = #tpu.dot_dimension_numbers<[1], [0], [0], [1], [0, 0, 1, 1], [], []>} : vector<16x16xf32>, vector<16x128xf32>, vector<16x128xf32> -> vector<16x128xf32>
    %61 = arith.addf %58, %60 : vector<16x128xf32>
    %cst_34 = arith.constant dense<0.000000e+00> : vector<16x128xf32>
    %62 = tpu.matmul %11, %59, %cst_34 {dimension_numbers = #tpu.dot_dimension_numbers<[1], [0], [0], [1], [0, 0, 1, 1], [], []>} : vector<16x16xf32>, vector<16x128xf32>, vector<16x128xf32> -> vector<16x128xf32>
    %63 = arith.addf %61, %62 : vector<16x128xf32>
    %64 = vector.broadcast %53 : vector<1x128xf32> to vector<16x128xf32>
    %65 = arith.mulf %63, %64 : vector<16x128xf32>
    %66 = vector.broadcast %54 : vector<1x128xf32> to vector<16x128xf32>
    %67 = arith.addf %65, %66 : vector<16x128xf32>
    %cst_35 = arith.constant 0.000000e+00 : f32
    %68 = vector.broadcast %cst_35 : f32 to vector<16x128xf32>
    %69 = arith.cmpf oge, %67, %68 : vector<16x128xf32>
    %cst_36 = arith.constant 1.41421354 : f32
    %70 = vector.broadcast %cst_36 : f32 to vector<16x128xf32>
    %71 = arith.mulf %70, %67 : vector<16x128xf32>
    %cst_37 = arith.constant 0.282842726 : f32
    %72 = vector.broadcast %cst_37 : f32 to vector<16x128xf32>
    %73 = arith.mulf %72, %67 : vector<16x128xf32>
    %74 = arith.select %69, %71, %73 : vector<16x128xi1>, vector<16x128xf32>
    %75 = arith.mulf %74, %74 : vector<16x128xf32>
    %cst_38 = arith.constant dense<0.000000e+00> : vector<16x128xf32>
    %76 = tpu.matmul %75, %12, %cst_38 {dimension_numbers = #tpu.dot_dimension_numbers<[1], [0], [0], [1], [0, 0, 1, 1], [], []>} : vector<16x128xf32>, vector<128x128xf32>, vector<16x128xf32> -> vector<16x128xf32>
    %cst_39 = arith.constant 9.99999993E-9 : f32
    %77 = vector.broadcast %cst_39 : f32 to vector<16x128xf32>
    %78 = arith.addf %76, %77 : vector<16x128xf32>
    %79 = math.rsqrt %78 : vector<16x128xf32>
    %80 = arith.mulf %74, %79 : vector<16x128xf32>
    %81 = vector.shape_cast %80 : vector<16x128xf32> to vector<1x16x128xf32>
    %c0_40 = arith.constant 0 : index
    %c0_41 = arith.constant 0 : index
    %c0_42 = arith.constant 0 : index
    %82 = vector.load %arg11[%c0_40, %c0_41, %c0_42] : memref<1x16x128xf32, #tpu.memory_space<vmem>>, vector<1x16x128xf32>
    tpu.vector_store %arg11[%c0_40, %c0_41, %c0_42], %81 {strides = array<i32>} : memref<1x16x128xf32, #tpu.memory_space<vmem>>, vector<1x16x128xf32>,
    return
  }
  func.func @transform_0(%arg0: i32) -> (i32, i32, i32) {
    %c0_i32 = arith.constant 0 : i32
    %c0_i32_0 = arith.constant 0 : i32
    %c0_i32_1 = arith.constant 0 : i32
    return %arg0, %c0_i32, %c0_i32_0 : i32, i32, i32
  }
  func.func @transform_1(%arg0: i32) -> (i32, i32, i32) {
    %c0_i32 = arith.constant 0 : i32
    %c0_i32_0 = arith.constant 0 : i32
    %c0_i32_1 = arith.constant 0 : i32
    return %arg0, %c0_i32, %c0_i32_0 : i32, i32, i32
  }
  func.func @transform_2(%arg0: i32) -> (i32, i32, i32) {
    %c0_i32 = arith.constant 0 : i32
    %c0_i32_0 = arith.constant 0 : i32
    %c0_i32_1 = arith.constant 0 : i32
    return %arg0, %c0_i32, %c0_i32_0 : i32, i32, i32
  }
  func.func @transform_3(%arg0: i32) -> (i32, i32, i32) {
    %c0_i32 = arith.constant 0 : i32
    %c0_i32_0 = arith.constant 0 : i32
    %c0_i32_1 = arith.constant 0 : i32
    return %arg0, %c0_i32, %c0_i32_0 : i32, i32, i32
  }
  func.func @transform_4(%arg0: i32) -> (i32, i32, i32) {
    %c0_i32 = arith.constant 0 : i32
    %c0_i32_0 = arith.constant 0 : i32
    %c0_i32_1 = arith.constant 0 : i32
    return %arg0, %c0_i32, %c0_i32_0 : i32, i32, i32
  }
  func.func @transform_5(%arg0: i32) -> (i32, i32) {
    %c0_i32 = arith.constant 0 : i32
    %c0_i32_0 = arith.constant 0 : i32
    %c0_i32_1 = arith.constant 0 : i32
    return %c0_i32, %c0_i32_0 : i32, i32
  }
  func.func @transform_6(%arg0: i32) -> (i32, i32) {
    %c0_i32 = arith.constant 0 : i32
    %c0_i32_0 = arith.constant 0 : i32
    %c0_i32_1 = arith.constant 0 : i32
    return %c0_i32, %c0_i32_0 : i32, i32
  }
  func.func @transform_7(%arg0: i32) -> (i32, i32) {
    %c0_i32 = arith.constant 0 : i32
    %c0_i32_0 = arith.constant 0 : i32
    %c0_i32_1 = arith.constant 0 : i32
    return %c0_i32, %c0_i32_0 : i32, i32
  }
  func.func @transform_8(%arg0: i32) -> (i32, i32) {
    %c0_i32 = arith.constant 0 : i32
    %c0_i32_0 = arith.constant 0 : i32
    %c0_i32_1 = arith.constant 0 : i32
    return %c0_i32, %c0_i32_0 : i32, i32
  }
  func.func @transform_9(%arg0: i32) -> (i32, i32) {
    %c0_i32 = arith.constant 0 : i32
    %c0_i32_0 = arith.constant 0 : i32
    %c0_i32_1 = arith.constant 0 : i32
    return %c0_i32, %c0_i32_0 : i32, i32
  }
  func.func @transform_10(%arg0: i32) -> (i32, i32, i32) {
    %c0_i32 = arith.constant 0 : i32
    %c0_i32_0 = arith.constant 0 : i32
    %c0_i32_1 = arith.constant 0 : i32
    return %arg0, %c0_i32, %c0_i32_0 : i32, i32, i32
  }
}

</mosaic_0001>

<bundles_post_ra>
// kernel: style_block_forward.1
= control target key start
LH: loop header
LB: loop body
LE: loop exit
PB: predicated region body
PF: predicated region fallthrough
CT: control target
= control target key end

     0   :  { %s1160_s13 = smov 0   ;;  %s1600_s0 = inlined_call_operand.vmem [shape: f32[2,16,64], index: 0, kind: input, shape index: {}]   ;;  %s1601_s1 = inlined_call_operand.vmem [shape: f32[2,1,64], index: 1, kind: input, shape index: {}]   ;;  %s1602_s2 = inlined_call_operand.vmem [shape: f32[2,1,128], index: 2, kind: input, shape index: {}]   ;;  %s1603_s3 = inlined_call_operand.vmem [shape: f32[2,1,128], index: 3, kind: input, shape index: {}]   ;;  %s1604_s4 = inlined_call_operand.vmem [shape: f32[2,1,128], index: 4, kind: input, shape index: {}]   ;;  %s1605_s5 = inlined_call_operand.vmem [shape: f32[64,384], index: 5, kind: input, shape index: {}]   ;;  %s1606_s6 = inlined_call_operand.vmem [shape: f32[128,384], index: 6, kind: input, shape index: {}]   ;;  %s1607_s7 = inlined_call_operand.vmem [shape: f32[1,128], index: 7, kind: input, shape index: {}]   ;;  %s1608_s8 = inlined_call_operand.vmem [shape: f32[1,128], index: 8, kind: input, shape index: {}]   ;;  %s1609_s9 = inlined_call_operand.vmem [shape: f32[128,128], index: 9, kind: input, shape index: {}]   ;;  %s1610_s10 = inlined_call_operand.vmem [shape: f32[2,16,128], index: 10, kind: output, shape index: {}]  }
   0x1 LB: > { %s1024_s14 = sadd.s32 4294967295, %s1102_s13   ;;  %p1028_p0 = scmp.ge.s32.totalorder %s1102_s13, 1  ;;  %s1102_s13 = sphi %s1160_s13, %s20_s13  }
   0x2   : > { %p344_p1 = scmp.lt.s32.totalorder %s1102_s13, 3 }
   0x4   : > { %p345_p2 = pnand %p1028_p0, %p344_p1 }
   0x5   : > { %p394_p3 = scmp.lt.s32.totalorder (!%p345_p2), %s1024_s14, 1 }
   0x6   : > { %348 = sbr.rel (%p345_p2) target bundleno = 917 (0x395), region = 60 }
   0xb   : > { %v484_v0 = vld [vmem:[%s1605_s5 + $0xa8] sm:$0xff]  ;;  %v486_v1 = vld [vmem:[%s1605_s5 + $0xb8] sm:$0xff]  ;;  %v481_v2 = vld [vmem:[%s1605_s5 + $0x90] sm:$0xff]  ;;  %s1612_s14 = smov (!%p394_p3, %s1024_s14), 1  ;;  %vm487_vm0 = vcmask 523264   ;;  %v416_v29 = vlaneseq  ;;  %v1104_v39 = vmov 0.0  }
   0xc   : > { %502 = vmatpush.msra.mxu0 %v484_v0  ;;  %548 = vmatpush.msra.mxu2 %v486_v1  ;;  %v483_v3 = vld [vmem:[%s1605_s5 + $0xa0] sm:$0xff]  ;;  %v478_v4 = vld [vmem:[%s1605_s5 + $0x78] sm:$0xff]  ;;  %v480_v5 = vld [vmem:[%s1605_s5 + $0x88] sm:$0xff]  ;;  %s1055_s11 = sshll.u32 %s1612_s14, 4  ;;  %s401_s16 = scalar_lea.vmem %s1601_s1, %s1612_s14  ;;  %vm563_vm2 = vcmask 130048  }
   0xd   : > { %v475_v6 = vld [vmem:[%s1605_s5 + $0x60] sm:$0xff]  ;;  %v477_v7 = vld [vmem:[%s1605_s5 + $0x70] sm:$0xff]  ;;  %v472_v8 = vld [vmem:[%s1605_s5 + $0x48] sm:$0xff]  ;;  %s398_s23 = scalar_lea.vmem %s1600_s0, %s1055_s11  ;;  %v417_v30 = vshrl.u32 %v416_v29, 7  ;;  %v420_v32 = vand.u32 127, %v416_v29  ;;  %s404_s25 = scalar_lea.vmem %s1602_s2, %s1612_s14 }
   0xe   : > { %503 = vmatpush.msra.mxu0 %v481_v2  ;;  %549 = vmatpush.msra.mxu2 %v483_v3  ;;  %v474_v9 = vld [vmem:[%s1605_s5 + $0x58] sm:$0xff]  ;;  %v469_v10 = vld [vmem:[%s1605_s5 + $0x30] sm:$0xff]  ;;  %v471_v11 = vld [vmem:[%s1605_s5 + $0x40] sm:$0xff]  ;;  %s407_s28 = scalar_lea.vmem %s1603_s3, %s1612_s14  ;;  %s410_s30 = scalar_lea.vmem %s1604_s4, %s1612_s14 }
   0xf   : > { %v1082_v12 = vld [vmem:[%s401_s16] ss:$0 sm:$0xff]  ;;  %v466_v14 = vld [vmem:[%s1605_s5 + $0x18] sm:$0xff]  ;;  %v468_v15 = vld [vmem:[%s1605_s5 + $0x28] sm:$0xff]  ;;  %v1033_v33 = vadd.s32 4294967295, %v417_v30  ;;  %v418_v37 = vadd.s32 8, %v417_v30  ;;  %s415_s19 = scalar_lea.vmem %s1610_s10, %s1055_s11 }
  0x10   : > { %504 = vmatpush.msra.mxu0 %v478_v4  ;;  %550 = vmatpush.msra.mxu2 %v480_v5  ;;  %v453_v13 = vld [vmem:[%s398_s23] sm:$0xff]  ;;  %v465_v17 = vld [vmem:[%s1605_s5 + $0x10] sm:$0xff]  ;;  %v454_v19 = vld [vmem:[%s398_s23 + $0x8] sm:$0xff]  ;;  %v429_v44 = vadd.s32 1, %v417_v30 }
  0x11   : > { %v463_v16 = vld [vmem:[%s1605_s5] sm:$0xff]  ;;  %v459_v18 = vmul.f32 %v1082_v12, %v453_v13  ;;  %v460_v20 = vmul.f32 %v1082_v12, %v454_v19  ;;  %v485_v21 = vld [vmem:[%s1605_s5 + $0xb0] sm:$0xff]  ;;  %v482_v22 = vld [vmem:[%s1605_s5 + $0x98] sm:$0xff]  ;;  %vm423_vm1 = vcmp.eq.s32.totalorder %v420_v32, %v1033_v33  ;;  %v1034_v41 = vadd.s32 4294967295, %v418_v37 }
  0x12   : > { %505 = vmatpush.msra.mxu0 %v475_v6  ;;  %551 = vmatpush.msra.mxu2 %v477_v7  ;;  %v479_v23 = vld [vmem:[%s1605_s5 + $0x80] sm:$0xff]  ;;  %v476_v24 = vld [vmem:[%s1605_s5 + $0x68] sm:$0xff]  ;;  %v473_v25 = vld [vmem:[%s1605_s5 + $0x50] sm:$0xff]  ;;  %v1270_v40 = vsel %vm423_vm1, 1.0, %v1104_v39  ;;  %vm431_vm4 = vcmp.eq.s32.totalorder %v420_v32, %v429_v44  ;;  %v430_v46 = vadd.s32 1, %v418_v37 }
  0x13   : > { %525 = vmatpush.msra.mxu1 %v485_v21  ;;  %v470_v26 = vld [vmem:[%s1605_s5 + $0x38] sm:$0xff]  ;;  %v467_v27 = vld [vmem:[%s1605_s5 + $0x20] sm:$0xff]  ;;  %v464_v28 = vld [vmem:[%s1605_s5 + $0x8] sm:$0xff]  ;;  %vm424_vm3 = vcmp.eq.s32.totalorder %v420_v32, %v1034_v41  ;;  %v1282_v45 = vsel %vm431_vm4, 1.0, %v1104_v39 }
  0x14   : > { %506 = vmatpush.msra.mxu0 %v472_v8  ;;  %552 = vmatpush.msra.mxu2 %v474_v9  ;;  %v1261_v34 = vld [vmem:[%s1609_s9 + $0x78] sm:$0xff]  ;;  %v1266_v35 = vld [vmem:[%s1609_s9 + $0x70] sm:$0xff]  ;;  %v1274_v43 = vsel %vm424_vm3, 1.0, %v1104_v39  ;;  %vm432_vm5 = vcmp.eq.s32.totalorder %v420_v32, %v430_v46  ;;  %v1293_v48 = vld [vmem:[%s1609_s9 + $0x68] sm:$0xff] }
  0x15   : > { %526 = vmatpush.msra.mxu1 %v482_v22  ;;  %v1286_v47 = vsel %vm432_vm5, 1.0, %v1104_v39  ;;  %v1299_v49 = vld [vmem:[%s1609_s9 + $0x60] sm:$0xff]  ;;  %v1304_v50 = vld [vmem:[%s1609_s9 + $0x58] sm:$0xff]  ;;  %v1310_v51 = vld [vmem:[%s1609_s9 + $0x50] sm:$0xff] }
  0x16   : > { %507 = vmatpush.msra.mxu0 %v469_v10  ;;  %553 = vmatpush.msra.mxu2 %v471_v11  ;;  %v1317_v52 = vld [vmem:[%s1609_s9 + $0x48] sm:$0xff]  ;;  %v1323_v53 = vld [vmem:[%s1609_s9 + $0x40] sm:$0xff]  ;;  %v1328_v54 = vld [vmem:[%s1609_s9 + $0x38] sm:$0xff] }
  0x17   : > { %527 = vmatpush.msra.mxu1 %v479_v23  ;;  %v1334_v55 = vld [vmem:[%s1609_s9 + $0x30] sm:$0xff]  ;;  %v1341_v56 = vld [vmem:[%s1609_s9 + $0x28] sm:$0xff]  ;;  %v1347_v57 = vld [vmem:[%s1609_s9 + $0x20] sm:$0xff] }
  0x18   : > { %508 = vmatpush.msra.mxu0 %v466_v14  ;;  %554 = vmatpush.msra.mxu2 %v468_v15  ;;  %v1353_v58 = vld [vmem:[%s1609_s9 + $0x18] sm:$0xff]  ;;  %v1359_v59 = vld [vmem:[%s1609_s9 + $0x10] sm:$0xff]  ;;  %v1365_v60 = vld [vmem:[%s1609_s9 + $0x8] sm:$0xff] }
  0x19   : > { %528 = vmatpush.msra.mxu1 %v476_v24  ;;  %v1371_v61 = vld [vmem:[%s1609_s9] sm:$0xff]  ;;  %v744_v63 = vld [vmem:[%s1606_s6 + $0x168] sm:$0xff]  ;;  %v745_v0 = vld [vmem:[%s1606_s6 + $0x170] sm:$0xff] }
  0x1a   : > { %509 = vmatpush.msra.mxu0 %v463_v16  ;;  %555 = vmatpush.msra.mxu2 %v465_v17  ;;  %v746_v1 = vld [vmem:[%s1606_s6 + $0x178] sm:$0xff]  ;;  %v741_v2 = vld [vmem:[%s1606_s6 + $0x150] sm:$0xff]  ;;  %v743_v4 = vld [vmem:[%s1606_s6 + $0x160] sm:$0xff] }
  0x1b   : > { %1039 = vmatmul.msk.f32.vlgmr.msra.gmra.mxu0 %vm487_vm0, %v459_v18  ;;  %1043 = vmatmul.msk.f32.vlgmr.msra.gmra.mxu2 %vm487_vm0, %v459_v18  ;;  %v742_v3 = vld [vmem:[%s1606_s6 + $0x158] sm:$0xff]  ;;  %v739_v6 = vld [vmem:[%s1606_s6 + $0x140] sm:$0xff]  ;;  %v740_v7 = vld [vmem:[%s1606_s6 + $0x148] sm:$0xff] }
  0x1c   : > { %529 = vmatpush.msra.mxu1 %v473_v25  ;;  %646 = vmatpush.msrb.mxu0 %v1261_v34  ;;  %v738_v5 = vld [vmem:[%s1606_s6 + $0x138] sm:$0xff]  ;;  %v1083_v11 = vld [vmem:[%s404_s25] ss:$0 sm:$0xff]  ;;  %v736_v32 = vld [vmem:[%s1606_s6 + $0x128] sm:$0xff] }
  0x1d   : > { %770 = vmatpush.msrb.mxu2 %v745_v0  ;;  %v1084_v14 = vld [vmem:[%s1607_s7] ss:$0 sm:$0xff]  ;;  %v737_v33 = vld [vmem:[%s1606_s6 + $0x130] sm:$0xff]  ;;  %v730_v41 = vld [vmem:[%s1606_s6 + $0xf8] sm:$0xff] }
  0x1e   : > { %530 = vmatpush.msra.mxu1 %v470_v26  ;;  %647 = vmatpush.msrb.mxu0 %v1266_v35  ;;  %v733_v37 = vld [vmem:[%s1606_s6 + $0x110] sm:$0xff]  ;;  %v726_v44 = vld [vmem:[%s1606_s6 + $0xd8] sm:$0xff]  ;;  %v727_v46 = vld [vmem:[%s1606_s6 + $0xe0] sm:$0xff] }
  0x1f   : > { %771 = vmatpush.msrb.mxu2 %v742_v3  ;;  %v729_v39 = vld [vmem:[%s1606_s6 + $0xf0] sm:$0xff]  ;;  %v724_v0 = vld [vmem:[%s1606_s6 + $0xc8] sm:$0xff] }
  0x20   : > { %531 = vmatpush.msra.mxu1 %v467_v27  ;;  %648 = vmatpush.msrb.mxu0 %v1293_v48  ;;  %v721_v3 = vld [vmem:[%s1606_s6 + $0xb0] sm:$0xff] }
  0x21   : > { %772 = vmatpush.msrb.mxu2 %v739_v6  ;;  %v718_v6 = vld [vmem:[%s1606_s6 + $0x98] sm:$0xff] }
  0x22   : > { %532 = vmatpush.msra.mxu1 %v464_v28  ;;  %649 = vmatpush.msrb.mxu0 %v1299_v49 }
  0x23   : > { %1040 = vmatmul.msk.f32.gmra.mxu0 %vm487_vm0, %v460_v20  ;;  %1044 = vmatmul.msk.f32.gmra.mxu2 %vm487_vm0, %v460_v20 }
  0x24   : > { %1041 = vmatmul.msk.f32.vlgmr.msra.gmra.mxu1 %vm487_vm0, %v459_v18  ;;  %650 = vmatpush.msrb.mxu0 %v1304_v50 }
  0x25   : > { %747 = vmatpush.msrb.mxu1 %v744_v63  ;;  %773 = vmatpush.msrb.mxu2 %v736_v32  ;;  %v723_v63 = vld [vmem:[%s1606_s6 + $0xc0] sm:$0xff] }
  0x26   : > { %651 = vmatpush.msrb.mxu0 %v1310_v51 }
  0x27   : > { %748 = vmatpush.msrb.mxu1 %v741_v2  ;;  %774 = vmatpush.msrb.mxu2 %v733_v37  ;;  %v720_v2 = vld [vmem:[%s1606_s6 + $0xa8] sm:$0xff] }
  0x28   : > { %652 = vmatpush.msrb.mxu0 %v1317_v52 }
  0x29   : > { %749 = vmatpush.msrb.mxu1 %v738_v5  ;;  %775 = vmatpush.msrb.mxu2 %v730_v41  ;;  %v717_v5 = vld [vmem:[%s1606_s6 + $0x90] sm:$0xff] }
  0x2a   : > { %653 = vmatpush.msrb.mxu0 %v1323_v53 }
  0x2b   : > { %776 = vmatpush.msrb.mxu2 %v727_v46 }
  0x2c   : > { %1042 = vmatmul.msk.f32.gmra.mxu1 %vm487_vm0, %v460_v20  ;;  %654 = vmatpush.msrb.mxu0 %v1328_v54 }
  0x2d   : > { %777 = vmatpush.msrb.mxu2 %v724_v0 }
  0x2e   : > { %655 = vmatpush.msrb.mxu0 %v1334_v55 }
  0x2f   : > { %778 = vmatpush.msrb.mxu2 %v721_v3 }
  0x30   : > { %656 = vmatpush.msrb.mxu0 %v1341_v56 }
  0x31   : > { %779 = vmatpush.msrb.mxu2 %v718_v6 }
  0x32   : > { %657 = vmatpush.msrb.mxu0 %v1347_v57 }
  0x34   : > { %658 = vmatpush.msrb.mxu0 %v1353_v58 }
  0x36   : > { %659 = vmatpush.msrb.mxu0 %v1359_v59 }
  0x38   : > { %660 = vmatpush.msrb.mxu0 %v1365_v60 }
  0x3a   : > { %661 = vmatpush.msrb.mxu0 %v1371_v61 }
  0x98   : > { %v511_v31 = vpop.f32.mrf.mxu0 }
  0x9e   : > { %v557_v36 = vpop.f32.mrf.mxu2 }
  0xa0   : > { %v514_v38 = vpop.f32.mrf.mxu0 }
  0xa1   : > { %584 = vmatpush.msra.mxu3 %v514_v38  ;;  %v534_v9 = vpop.f32.mrf.mxu1  ;;  %v734_v38 = vld [vmem:[%s1606_s6 + $0x118] sm:$0xff] }
  0xa3   : > { %585 = vmatpush.msra.mxu3 %v511_v31  ;;  %v735_v31 = vld [vmem:[%s1606_s6 + $0x120] sm:$0xff] }
  0xa4   : > { %1045 = vmatmul.msk.f32.vlgmr.msra.gmra.mxu3 %vm563_vm2, %v1270_v40  ;;  %750 = vmatpush.msrb.mxu1 %v735_v31 }
  0xa6   : > { %v560_v42 = vpop.f32.mrf.mxu2 }
  0xa7   : > { %615 = vmatpush.msrb.mxu3 %v560_v42  ;;  %v731_v42 = vld [vmem:[%s1606_s6 + $0x100] sm:$0xff] }
  0xa9   : > { %616 = vmatpush.msrb.mxu3 %v557_v36  ;;  %v537_v16 = vpop.f32.mrf.mxu1  ;;  %v732_v36 = vld [vmem:[%s1606_s6 + $0x108] sm:$0xff] }
  0xaa   : > { %751 = vmatpush.msrb.mxu1 %v732_v36 }
  0xab   : > { %793 = vmatpush.msra.mxu3 %v746_v1  ;;  %v725_v1 = vld [vmem:[%s1606_s6 + $0xd0] sm:$0xff] }
  0xac   : > { %1046 = vmatmul.msk.f32.gmra.mxu3 %vm563_vm2, %v1274_v43  ;;  %752 = vmatpush.msrb.mxu1 %v729_v39 }
  0xad   : > { %794 = vmatpush.msra.mxu3 %v743_v4  ;;  %v722_v4 = vld [vmem:[%s1606_s6 + $0xb8] sm:$0xff] }
  0xae   : > { %753 = vmatpush.msrb.mxu1 %v726_v44  ;;  %v1086_v44 = vld [vmem:[%s410_s30] ss:$0 sm:$0xff] }
  0xaf   : > { %795 = vmatpush.msra.mxu3 %v740_v7  ;;  %v719_v7 = vld [vmem:[%s1606_s6 + $0xa0] sm:$0xff] }
  0xb0   : > { %754 = vmatpush.msrb.mxu1 %v723_v63 }
  0xb1   : > { %796 = vmatpush.msra.mxu3 %v737_v33 }
  0xb2   : > { %755 = vmatpush.msrb.mxu1 %v720_v2 }
  0xb3   : > { %797 = vmatpush.msra.mxu3 %v734_v38 }
  0xb4   : > { %1047 = vmatmul.msk.f32.vlgmr.msrb.gmra.mxu3 %vm563_vm2, %v1282_v45  ;;  %756 = vmatpush.msrb.mxu1 %v717_v5 }
  0xb5   : > { %798 = vmatpush.msra.mxu3 %v731_v42 }
  0xbc   : > { %1048 = vmatmul.msk.f32.gmra.mxu3 %vm563_vm2, %v1286_v47 }
 0x127   : > { %v587_v62 = vpop.f32.mrf.mxu3 }
 0x128   : > { %v593_v10 = vadd.f32 %v587_v62, %v534_v9  ;;  %v728_v62 = vld [vmem:[%s1606_s6 + $0xe8] sm:$0xff]  ;;  %v715_v9 = vld [vmem:[%s1606_s6 + $0x80] sm:$0xff] }
 0x129   : > { %799 = vmatpush.msra.mxu3 %v728_v62  ;;  %780 = vmatpush.msrb.mxu2 %v715_v9 }
 0x12b   : > { %800 = vmatpush.msra.mxu3 %v725_v1 }
 0x12d   : > { %801 = vmatpush.msra.mxu3 %v722_v4 }
 0x12f   : > { %v590_v8 = vpop.f32.mrf.mxu3  ;;  %802 = vmatpush.msra.mxu3 %v719_v7 }
 0x130   : > { %v594_v18 = vadd.f32 %v590_v8, %v537_v16  ;;  %v714_v8 = vld [vmem:[%s1606_s6 + $0x78] sm:$0xff] }
 0x131   : > { %757 = vmatpush.msrb.mxu1 %v714_v8  ;;  %v710_v16 = vld [vmem:[%s1606_s6 + $0x58] sm:$0xff] }
 0x137   : > { %v618_v12 = vpop.f32.mrf.mxu3 }
 0x138   : > { %v624_v13 = vadd.f32 %v618_v12, %v593_v10  ;;  %v716_v10 = vld [vmem:[%s1606_s6 + $0x88] sm:$0xff] }
 0x139   : > { %803 = vmatpush.msra.mxu3 %v716_v10  ;;  %v712_v12 = vld [vmem:[%s1606_s6 + $0x68] sm:$0xff] }
 0x13a   : > { %v629_v15 = vmul.f32 %v1083_v11, %v624_v13  ;;  %v713_v13 = vld [vmem:[%s1606_s6 + $0x70] sm:$0xff]  ;;  %781 = vmatpush.msrb.mxu2 %v712_v12 }
 0x13b   : > { %804 = vmatpush.msra.mxu3 %v713_v13 }
 0x13c   : > { %v634_v17 = vadd.f32 %v1084_v14, %v629_v15  ;;  %v709_v15 = vld [vmem:[%s1606_s6 + $0x50] sm:$0xff] }
 0x13d   : > { %782 = vmatpush.msrb.mxu2 %v709_v15  ;;  %805 = vmatpush.msra.mxu3 %v710_v16 }
 0x13e   : > { %v638_v19 = vmul.f32 1.4142135, %v634_v17  ;;  %v640_v20 = vmul.f32 0.28284273, %v634_v17  ;;  %vm636_vm6 = vcmp.ge.f32.partialorder %v634_v17, 0.0  ;;  %v705_v17 = vld [vmem:[%s1606_s6 + $0x30] sm:$0xff] }
 0x13f   : > { %v621_v21 = vpop.f32.mrf.mxu3 }
 0x140   : > { %v625_v22 = vadd.f32 %v621_v21, %v594_v18  ;;  %v1409_v23 = vsel %vm636_vm6, %v638_v19, %v640_v20  ;;  %v706_v18 = vld [vmem:[%s1606_s6 + $0x38] sm:$0xff]  ;;  %v707_v19 = vld [vmem:[%s1606_s6 + $0x40] sm:$0xff] }
 0x141   : > { %v644_v24 = vmul.f32 %v1409_v23, %v1409_v23  ;;  %783 = vmatpush.msrb.mxu2 %v706_v18  ;;  %806 = vmatpush.msra.mxu3 %v707_v19  ;;  %v702_v20 = vld [vmem:[%s1606_s6 + $0x18] sm:$0xff]  ;;  %v703_v21 = vld [vmem:[%s1606_s6 + $0x20] sm:$0xff] }
 0x142   : > { %v630_v25 = vmul.f32 %v1083_v11, %v625_v22  ;;  %v711_v11 = vld [vmem:[%s1606_s6 + $0x60] sm:$0xff]  ;;  %v704_v22 = vld [vmem:[%s1606_s6 + $0x28] sm:$0xff] }
 0x143   : > { %662 = vmatmul.f32.vlgmr.msrb.gmra.mxu0 %v644_v24  ;;  %758 = vmatpush.msrb.mxu1 %v711_v11  ;;  %v699_v24 = vld [vmem:[%s1606_s6] sm:$0xff] }
 0x144   : > { %v635_v26 = vadd.f32 %v1084_v14, %v630_v25  ;;  %v708_v14 = vld [vmem:[%s1606_s6 + $0x48] sm:$0xff]  ;;  %784 = vmatpush.msrb.mxu2 %v703_v21  ;;  %807 = vmatpush.msra.mxu3 %v704_v22 }
 0x145   : > { %759 = vmatpush.msrb.mxu1 %v708_v14  ;;  %v700_v25 = vld [vmem:[%s1606_s6 + $0x8] sm:$0xff] }
 0x146   : > { %vm637_vm7 = vcmp.ge.f32.partialorder %v635_v26, 0.0  ;;  %v639_v27 = vmul.f32 1.4142135, %v635_v26  ;;  %v641_v28 = vmul.f32 0.28284273, %v635_v26  ;;  %v701_v26 = vld [vmem:[%s1606_s6 + $0x10] sm:$0xff]  ;;  %785 = vmatpush.msrb.mxu2 %v700_v25 }
 0x147   : > { %760 = vmatpush.msrb.mxu1 %v705_v17  ;;  %808 = vmatpush.msra.mxu3 %v701_v26 }
 0x148   : > { %v1413_v29 = vsel %vm637_vm7, %v639_v27, %v641_v28  ;;  %886 = vmatpush.msra.mxu2 %v1261_v34 }
 0x149   : > { %v645_v30 = vmul.f32 %v1413_v29, %v1413_v29  ;;  %761 = vmatpush.msrb.mxu1 %v702_v20  ;;  %1057 = vmatpush.msrb.mxu3 %v1261_v34 }
 0x14a   : > { %887 = vmatpush.msra.mxu2 %v1266_v35 }
 0x14b   : > { %665 = vmatmul.f32.gmra.mxu0 %v645_v30  ;;  %762 = vmatpush.msrb.mxu1 %v699_v24 }
 0x14c   : > { %1058 = vmatpush.msrb.mxu3 %v1266_v35  ;;  %888 = vmatpush.msra.mxu2 %v1293_v48 }
 0x14e   : > { %1059 = vmatpush.msrb.mxu3 %v1293_v48  ;;  %889 = vmatpush.msra.mxu2 %v1299_v49 }
 0x150   : > { %1060 = vmatpush.msrb.mxu3 %v1299_v49  ;;  %890 = vmatpush.msra.mxu2 %v1304_v50 }
 0x152   : > { %1061 = vmatpush.msrb.mxu3 %v1304_v50  ;;  %891 = vmatpush.msra.mxu2 %v1310_v51 }
 0x154   : > { %1062 = vmatpush.msrb.mxu3 %v1310_v51  ;;  %892 = vmatpush.msra.mxu2 %v1317_v52 }
 0x156   : > { %1063 = vmatpush.msrb.mxu3 %v1317_v52  ;;  %893 = vmatpush.msra.mxu2 %v1323_v53 }
 0x158   : > { %1064 = vmatpush.msrb.mxu3 %v1323_v53  ;;  %894 = vmatpush.msra.mxu2 %v1328_v54 }
 0x15a   : > { %1065 = vmatpush.msrb.mxu3 %v1328_v54  ;;  %895 = vmatpush.msra.mxu2 %v1334_v55 }
 0x15c   : > { %1066 = vmatpush.msrb.mxu3 %v1334_v55  ;;  %896 = vmatpush.msra.mxu2 %v1341_v56  ;;  %v1085_v55 = vld [vmem:[%s407_s28] ss:$0 sm:$0xff] }
 0x15e   : > { %1067 = vmatpush.msrb.mxu3 %v1341_v56  ;;  %897 = vmatpush.msra.mxu2 %v1347_v57 }
 0x160   : > { %1068 = vmatpush.msrb.mxu3 %v1347_v57  ;;  %898 = vmatpush.msra.mxu2 %v1353_v58 }
 0x162   : > { %1069 = vmatpush.msrb.mxu3 %v1353_v58  ;;  %899 = vmatpush.msra.mxu2 %v1359_v59 }
 0x164   : > { %1070 = vmatpush.msrb.mxu3 %v1359_v59  ;;  %900 = vmatpush.msra.mxu2 %v1365_v60 }
 0x166   : > { %1071 = vmatpush.msrb.mxu3 %v1365_v60  ;;  %901 = vmatpush.msra.mxu2 %v1371_v61 }
 0x168   : > { %1072 = vmatpush.msrb.mxu3 %v1371_v61 }
 0x1c0   : > { %v663_v27 = vpop.f32.mrf.mxu0 }
 0x1c1   : > { %v664_v28 = vadd.f32 1e-08, %v663_v27 }
 0x1c3   : > { %1088 = vrsqrt.f32 %v664_v28  ;;  %vm675_vm9 = vweird.f32 %v664_v28 }
 0x1c8   : > { %v666_v34 = vpop.f32.mrf.mxu0 }
 0x1c9   : > { %v1089_v35 = vpop.eup %1088  ;;  %v667_v48 = vadd.f32 1e-08, %v666_v34 }
 0x1ca   : > { %v670_v49 = vmul.f32 %v1089_v35, %v664_v28  ;;  %vm676_vm8 = vweird.f32 %v1089_v35 }
 0x1cb   : > { %1090 = vrsqrt.f32 %v667_v48  ;;  %vm677_vm10 = vmor %vm675_vm9, %vm676_vm8  ;;  %vm685_vm12 = vweird.f32 %v667_v48 }
 0x1cc   : > { %v671_v50 = vmul.f32 %v1089_v35, %v670_v49 }
 0x1ce   : > { %v672_v51 = vmul.f32 0.5, %v671_v50 }
 0x1d0   : > { %v673_v52 = vsub.f32 1.5, %v672_v51 }
 0x1d1   : > { %v1091_v53 = vpop.eup %1090 }
 0x1d2   : > { %v674_v54 = vmul.f32 %v1089_v35, %v673_v52  ;;  %v680_v30 = vmul.f32 %v1091_v53, %v667_v48  ;;  %vm686_vm11 = vweird.f32 %v1091_v53 }
 0x1d3   : > { %vm687_vm13 = vmor %vm685_vm12, %vm686_vm11 }
 0x1d4   : > { %v681_v56 = vmul.f32 %v1091_v53, %v680_v30  ;;  %v678_v31 = vsel %vm677_vm10, %v1089_v35, %v674_v54 }
 0x1d5   : > { %v689_v57 = vmul.f32 %v678_v31, %v1409_v23 }
 0x1d6   : > { %v682_v32 = vmul.f32 0.5, %v681_v56 }
 0x1d7   : > { %v695_v58 = vmul.f32 %v1085_v55, %v689_v57 }
 0x1d8   : > { %v683_v33 = vsub.f32 1.5, %v682_v32 }
 0x1d9   : > { %763 = vmatmul.f32.vlgmr.msrb.gmra.mxu1 %v695_v58  ;;  %786 = vmatmul.f32.vlgmr.msrb.gmra.mxu2 %v695_v58 }
 0x1da   : > { %v684_v36 = vmul.f32 %v1091_v53, %v683_v33  ;;  %809 = vmatmul.f32.vlgmr.msra.gmra.mxu3 %v695_v58 }
 0x1dc   : > { %v688_v59 = vsel %vm687_vm13, %v1091_v53, %v684_v36 }
 0x1dd   : > { %v690_v23 = vmul.f32 %v688_v59, %v1413_v29 }
 0x1df   : > { %v696_v37 = vmul.f32 %v1085_v55, %v690_v23 }
 0x1e1   : > { %766 = vmatmul.f32.gmra.mxu1 %v696_v37  ;;  %789 = vmatmul.f32.gmra.mxu2 %v696_v37 }
 0x1e2   : > { %812 = vmatmul.f32.gmra.mxu3 %v696_v37 }
 0x256   : > { %v764_v60 = vpop.f32.mrf.mxu1 }
 0x25c   : > { %v787_v41 = vpop.f32.mrf.mxu2 }
 0x25d   : > { %v810_v38 = vpop.f32.mrf.mxu3 }
 0x25e   : > { %v767_v39 = vpop.f32.mrf.mxu1 }
 0x25f   : > { %830 = vmatpush.msra.mxu0 %v767_v39 }
 0x261   : > { %831 = vmatpush.msra.mxu0 %v764_v60 }
 0x262   : > { %1049 = vmatmul.msk.f32.vlgmr.msra.gmra.mxu0 %vm563_vm2, %v1270_v40  ;;  %v1087_v40 = vld [vmem:[%s1608_s8] ss:$0 sm:$0xff] }
 0x265   : > { %v813_v61 = vpop.f32.mrf.mxu3 }
 0x266   : > { %855 = vmatpush.msra.mxu1 %v813_v61 }
 0x268   : > { %856 = vmatpush.msra.mxu1 %v810_v38 }
 0x269   : > { %1051 = vmatmul.msk.f32.vlgmr.msra.gmra.mxu1 %vm563_vm2, %v1282_v45  ;;  %v790_v45 = vpop.f32.mrf.mxu2 }
 0x26a   : > { %1050 = vmatmul.msk.f32.gmra.mxu0 %vm563_vm2, %v1274_v43 }
 0x271   : > { %1052 = vmatmul.msk.f32.gmra.mxu1 %vm563_vm2, %v1286_v47 }
 0x2df   : > { %v833_v29 = vpop.f32.mrf.mxu0 }
 0x2e0   : > { %v839_v42 = vadd.f32 %v833_v29, %v787_v41 }
 0x2e6   : > { %v858_v46 = vpop.f32.mrf.mxu1 }
 0x2e7   : > { %v864_v62 = vadd.f32 %v858_v46, %v839_v42  ;;  %v836_v0 = vpop.f32.mrf.mxu0 }
 0x2e8   : > { %v840_v3 = vadd.f32 %v836_v0, %v790_v45 }
 0x2e9   : > { %v869_v63 = vmul.f32 %v1086_v44, %v864_v62 }
 0x2eb   : > { %v874_v1 = vadd.f32 %v1087_v40, %v869_v63 }
 0x2ed   : > { %vm876_vm14 = vcmp.ge.f32.partialorder %v874_v1, 0.0  ;;  %v878_v2 = vmul.f32 1.4142135, %v874_v1  ;;  %v880_v43 = vmul.f32 0.28284273, %v874_v1 }
 0x2ee   : > { %v861_v4 = vpop.f32.mrf.mxu1 }
 0x2ef   : > { %v865_v47 = vadd.f32 %v861_v4, %v840_v3  ;;  %v882_v5 = vsel %vm876_vm14, %v878_v2, %v880_v43 }
 0x2f0   : > { %v884_v6 = vmul.f32 %v882_v5, %v882_v5 }
 0x2f1   : > { %v870_v7 = vmul.f32 %v1086_v44, %v865_v47 }
 0x2f2   : > { %902 = vmatmul.f32.vlgmr.msra.gmra.mxu2 %v884_v6 }
 0x2f3   : > { %v875_v8 = vadd.f32 %v1087_v40, %v870_v7 }
 0x2f5   : > { %vm877_vm15 = vcmp.ge.f32.partialorder %v875_v8, 0.0  ;;  %v879_v9 = vmul.f32 1.4142135, %v875_v8  ;;  %v881_v10 = vmul.f32 0.28284273, %v875_v8 }
 0x2f7   : > { %v883_v11 = vsel %vm877_vm15, %v879_v9, %v881_v10 }
 0x2f8   : > { %v885_v12 = vmul.f32 %v883_v11, %v883_v11 }
 0x2fa   : > { %905 = vmatmul.f32.vlgmr.msrb.gmra.mxu3 %v885_v12 }
 0x375   : > { %v903_v13 = vpop.f32.mrf.mxu2 }
 0x376   : > { %v904_v14 = vadd.f32 1e-08, %v903_v13 }
 0x378   : > { %1092 = vrsqrt.f32 %v904_v14  ;;  %vm915_vm1 = vweird.f32 %v904_v14 }
 0x37d   : > { %v906_v15 = vpop.f32.mrf.mxu3 }
 0x37e   : > { %v1093_v16 = vpop.eup %1092  ;;  %v907_v17 = vadd.f32 1e-08, %v906_v15 }
 0x37f   : > { %v910_v18 = vmul.f32 %v1093_v16, %v904_v14  ;;  %vm916_vm0 = vweird.f32 %v1093_v16 }
 0x380   : > { %1094 = vrsqrt.f32 %v907_v17  ;;  %vm917_vm2 = vmor %vm915_vm1, %vm916_vm0  ;;  %vm925_vm4 = vweird.f32 %v907_v17 }
 0x381   : > { %v911_v19 = vmul.f32 %v1093_v16, %v910_v18 }
 0x383   : > { %v912_v20 = vmul.f32 0.5, %v911_v19 }
 0x385   : > { %v913_v21 = vsub.f32 1.5, %v912_v20 }
 0x386   : > { %v1095_v22 = vpop.eup %1094 }
 0x387   : > { %v914_v24 = vmul.f32 %v1093_v16, %v913_v21  ;;  %v920_v25 = vmul.f32 %v1095_v22, %v907_v17  ;;  %vm926_vm3 = vweird.f32 %v1095_v22 }
 0x388   : > { %vm927_vm5 = vmor %vm925_vm4, %vm926_vm3 }
 0x389   : > { %v918_v26 = vsel %vm917_vm2, %v1093_v16, %v914_v24  ;;  %v921_v27 = vmul.f32 %v1095_v22, %v920_v25 }
 0x38a   : > { %v929_v28 = vmul.f32 %v918_v26, %v882_v5 }
 0x38b   : > { %v922_v34 = vmul.f32 0.5, %v921_v27 }
 0x38c   : > { %931 = vst [vmem:[%s415_s19] sm:$0xff] %v929_v28 }
 0x38d   : > { %v923_v35 = vsub.f32 1.5, %v922_v34 }
 0x38f   : > { %v924_v48 = vmul.f32 %v1095_v22, %v923_v35 }
 0x391   : > { %v928_v49 = vsel %vm927_vm5, %v1095_v22, %v924_v48 }
 0x392   : > { %v930_v50 = vmul.f32 %v928_v49, %v883_v11 }
 0x394   : > { %932 = vst [vmem:[%s415_s19 + $0x8] sm:$0xff] %v930_v50 }
 0x395 PF: > { %s20_s13 = sadd.s32 1, %s1102_s13  }
 0x396   : > { %p17_p4 = scmp.ge.s32.totalorder %s20_s13, 4  }
 0x398   :  { %19 = sbr.rel (!%p17_p4) target bundleno = 1 (0x1), region = 102 }

</bundles_post_ra>
